<compile_context>
chip_gen: v7x
topology: tpu7x:2x2x1
jax: 0.10.0
libtpu: 0.0.40
codegen_flags: <defaults>
</compile_context>

<pallas_src>
import functools

import jax
import jax.numpy as jnp
from jax.experimental import pallas as pl
from jax.experimental.pallas import tpu as pltpu

NEG_INF = -10000.0
LANE = 128
SUBLANE = 8


def _round_up(x, m):
    return (x + m - 1) // m * m


# ---------------------------------------------------------------------------
# Pallas kernel 1: hidden2label  (N,H) bf16 @ (H,LPAD) bf16 + b -> (N,LPAD) bf16
# ---------------------------------------------------------------------------
def _linear_kernel(x_ref, w_ref, b_ref, o_ref):
    acc = jnp.dot(x_ref[...], w_ref[...], preferred_element_type=jnp.float32)
    o_ref[...] = (acc + b_ref[...]).astype(o_ref.dtype)


def hidden2label(x_bf16, w_bf16, b_f32, *, tile_n=1024):
    """x: (N, H) bf16, w: (H, LPAD) bf16, b: (1, LPAD) f32 -> (N, LPAD) bf16."""
    N, H = x_bf16.shape
    Lp = w_bf16.shape[1]
    tile_n = min(tile_n, N)
    return pl.pallas_call(
        _linear_kernel,
        out_shape=jax.ShapeDtypeStruct((N, Lp), jnp.bfloat16),
        grid=(pl.cdiv(N, tile_n),),
        in_specs=[
            pl.BlockSpec((tile_n, H), lambda i: (i, 0)),   # pipelined row tiles
            pl.BlockSpec((H, Lp), lambda i: (0, 0)),       # weights resident
            pl.BlockSpec((1, Lp), lambda i: (0, 0)),       # bias resident (f32)
        ],
        out_specs=pl.BlockSpec((tile_n, Lp), lambda i: (i, 0)),
        compiler_params=pltpu.CompilerParams(
            dimension_semantics=("parallel",)),
    )(x_bf16, w_bf16, b_f32)


# ---------------------------------------------------------------------------
# Pallas kernel 2: CRF Viterbi decode (max-product recursion + backtrack)
# ---------------------------------------------------------------------------
def _viterbi_kernel(feats_ref, trans_ref, score_ref, path_ref,
                    emis_scr, delta_scr, psi_scr, *, start_label_id):
    TB, T, Lp = feats_ref.shape       # batch tile, time, lane-padded prev axis
    L8 = trans_ref.shape[0]           # sublane-padded "new label" axis

    # Upcast emissions once (bf16 HBM block -> f32 VMEM scratch): the serial
    # loop then does f32 math and dynamic sublane slices on an unpacked dtype.
    emis_scr[...] = feats_ref[...].astype(jnp.float32)

    # Batch-free hoisted loop invariants (a few vregs, not TB x 64 KB).
    lane_ids = jax.lax.broadcasted_iota(jnp.int32, (1, 1, Lp), 2)      # prev ids
    prev_ids = jax.lax.broadcasted_iota(jnp.int32, (1, 1, L8, Lp), 3)  # prev ids
    new_ids = jax.lax.broadcasted_iota(jnp.int32, (1, 1, L8), 2)       # new ids
    trans_b = trans_ref[...][None, None, :, :]                         # (1,1,L8,Lp)

    # log_delta init = NEG_INF everywhere except the start label (= 0).
    # Padded lanes (>= L8) are never rewritten, so they stay NEG_INF forever
    # and can never win a max.  (feats[:, 0] is never added -- matches torch.)
    delta_scr[...] = jnp.broadcast_to(
        jnp.where(lane_ids == start_label_id,
                  jnp.float32(0.0), jnp.float32(NEG_INF)), (TB, 1, Lp))

    @pl.loop(1, T)
    def _(t):
        # scores[b, 0, new, prev] = trans[new, prev] + delta[b, prev]
        scores = trans_b + delta_scr[...][:, :, None, :]               # (TB,1,L8,Lp)
        m = jnp.max(scores, axis=-1)                                   # (TB,1,L8)
        # First-maximum tie break (min index among maxima), like torch.max.
        # TODO(synk): fuse max+argmax into one reduction once Mosaic supports
        # variadic reduces; compare/min kept for lowering robustness.
        amax = jnp.min(jnp.where(scores == m[..., None], prev_ids, Lp),
                       axis=-1).astype(jnp.int32)                      # (TB,1,L8)
        ft = emis_scr[:, pl.ds(t, 1), :]                               # (TB,1,Lp)
        delta_scr[:, :, :L8] = m + ft[:, :, :L8]
        psi_scr[:, pl.ds(t, 1), :] = amax

    delta = delta_scr[...]                                             # (TB,1,Lp)
    best = jnp.max(delta, axis=-1, keepdims=True)                      # (TB,1,1)
    last = jnp.min(jnp.where(delta == best, lane_ids, Lp),
                   axis=-1, keepdims=True).astype(jnp.int32)           # (TB,1,1)
    score_ref[...] = best
    path_ref[:, pl.ds(T - 1, 1), :] = last

    # Backtrack: path[t] = psi[t+1][path[t+1]]  (one-hot gather over L8 lanes).
    def back_body(s, cur):
        t = T - 2 - s
        psi_next = psi_scr[:, pl.ds(t + 1, 1), :]                      # (TB,1,L8)
        nxt = jnp.sum(jnp.where(new_ids == cur, psi_next, 0),
                      axis=-1, keepdims=True).astype(jnp.int32)        # (TB,1,1)
        path_ref[:, pl.ds(t, 1), :] = nxt
        return nxt

    if T > 1:
        jax.lax.fori_loop(0, T - 1, back_body, last,
                          unroll=min(8, T - 1))


def _pick_num_batch_tiles(batch, target=4):
    for nt in range(min(target, batch), 0, -1):
        if batch % nt == 0:
            return nt
    return 1


def viterbi_decode(feats_bf16, transitions, start_label_id, *,
                   num_batch_tiles=None):
    """feats: (B, T, LPAD) bf16 (padded labels carry NEG_INF emissions),
    transitions: (L8, LPAD) f32 (NEG_INF outside real labels).
    Returns (score (B,) f32, path (B, T) int32)."""
    B, T, Lp = feats_bf16.shape
    L8 = transitions.shape[0]
    if num_batch_tiles is None:
        # >= 2 grid steps per TensorCore (v7x has 2 TCs) so the feats DMA
        # double-buffers, while keeping per-tile VMEM (emissions + psi) small.
        num_batch_tiles = _pick_num_batch_tiles(B)
    assert B % num_batch_tiles == 0
    TB = B // num_batch_tiles
    kernel = functools.partial(_viterbi_kernel, start_label_id=start_label_id)
    score, path = pl.pallas_call(
        kernel,
        out_shape=(
            jax.ShapeDtypeStruct((B, 1, 1), jnp.float32),
            jax.ShapeDtypeStruct((B, T, 1), jnp.int32),
        ),
        grid=(num_batch_tiles,),
        in_specs=[
            pl.BlockSpec((TB, T, Lp), lambda i: (i, 0, 0)),
            pl.BlockSpec((L8, Lp), lambda i: (0, 0)),
        ],
        out_specs=(
            pl.BlockSpec((TB, 1, 1), lambda i: (i, 0, 0)),
            pl.BlockSpec((TB, T, 1), lambda i: (i, 0, 0)),
        ),
        scratch_shapes=[
            pltpu.VMEM((TB, T, Lp), jnp.float32),   # f32 emissions (upcast once)
            pltpu.VMEM((TB, 1, Lp), jnp.float32),   # log_delta
            # TODO(synk): int16 psi would halve VMEM on v7x; int32 kept because
            # dynamic-sublane stores of packed dtypes are the riskier lowering.
            pltpu.VMEM((TB, T, L8), jnp.int32),     # psi backpointers
        ],
        compiler_params=pltpu.CompilerParams(
            dimension_semantics=("parallel",)),
    )(feats_bf16, transitions)
    return score.reshape(B), path.reshape(B, T)


# ---------------------------------------------------------------------------
# Module equivalent
# ---------------------------------------------------------------------------
class BertCrfNerPallas:
    def __init__(self, key, vocab_size, hidden_size, num_labels,
                 start_label_id, stop_label_id):
        self.hidden_size = hidden_size
        self.num_labels = num_labels
        self.start_label_id = start_label_id
        self.stop_label_id = stop_label_id
        self.lpad = _round_up(max(num_labels, 1), LANE)     # lane-dense prev axis
        self.l8 = _round_up(max(num_labels, 1), SUBLANE)    # sublane new axis

        k_emb, k_w, k_t = jax.random.split(key, 3)

        # TODO(synk): the real module wraps an external BERT encoder; it is
        # replaced here by a deterministic embedding lookup producing the
        # (B, T, H) sequence output (attention_mask therefore unused).
        # Stored bf16 so the gather feeds the MXU matmul without a cast pass.
        self.embedding = (0.02 * jax.random.normal(
            k_emb, (vocab_size, hidden_size), jnp.float32)).astype(jnp.bfloat16)

        # hidden2label: xavier_uniform_ weight (L, H), zero bias; stored
        # transposed, zero-padded to LPAD columns, bf16 for the MXU.
        # Padded label columns get NEG_INF bias so padded emissions never win.
        limit = (6.0 / (hidden_size + num_labels)) ** 0.5
        w = jax.random.uniform(k_w, (num_labels, hidden_size), jnp.float32,
                               -limit, limit)
        w_pad = jnp.zeros((hidden_size, self.lpad), jnp.float32)
        self.w = w_pad.at[:, :num_labels].set(
            jnp.transpose(w)).astype(jnp.bfloat16)                   # (H, LPAD)
        self.b = jnp.full((1, self.lpad), NEG_INF,
                          jnp.float32).at[0, :num_labels].set(0.0)   # (1, LPAD)

        # CRF transitions: randn, start row / stop column masked with NEG_INF.
        # Only L8 (sublane-padded) "new label" rows are materialized; padded
        # rows / prev columns are NEG_INF so padded labels are unreachable.
        trans = jax.random.normal(k_t, (num_labels, num_labels), jnp.float32)
        trans = trans.at[start_label_id, :].set(NEG_INF)
        trans = trans.at[:, stop_label_id].set(NEG_INF)
        self.transitions = jnp.full(
            (self.l8, self.lpad), NEG_INF,
            jnp.float32).at[:num_labels, :num_labels].set(trans)

    def _get_bert_features(self, input_ids, input_mask):
        B, T = input_ids.shape
        seq_out = jnp.take(self.embedding, input_ids, axis=0)       # (B,T,H) bf16
        # dropout(p=0.2) is identity at inference.
        x = seq_out.reshape(B * T, self.hidden_size)
        feats = hidden2label(x, self.w, self.b)                     # (B*T,LPAD) bf16
        return feats.reshape(B, T, self.lpad)

    def forward(self, input_ids, input_mask):
        feats = self._get_bert_features(input_ids, input_mask)
        score, path = viterbi_decode(feats, self.transitions,
                                     self.start_label_id)
        # path is int32 (PyTorch returns int64); values are < num_labels.
        return score, path


if __name__ == "__main__":
    key = jax.random.PRNGKey(0)
    B, T, H, L, V = 4, 8, 32, 8, 50
    start_id, stop_id = 6, 7

    model = BertCrfNerPallas(key, V, H, L, start_id, stop_id)

    k_ids = jax.random.fold_in(key, 1)
    input_ids = jax.random.randint(k_ids, (B, T), 0, V, dtype=jnp.int32)
    input_mask = jnp.ones((B, T), jnp.int32)

    score, path = model.forward(input_ids, input_mask)
    jax.block_until_ready((score, path))
    assert score.shape == (B,) and path.shape == (B, T)
    assert int(jnp.min(path)) >= 0 and int(jnp.max(path)) < L  # pads never win
    print("KERNEL_OK")
</pallas_src>

<mosaic_0001>
module attributes {stable_mosaic.version = 11 : i64} {
  func.func @_linear_kernel(%arg0: i32, %arg1: memref<32x32xbf16, #tpu.memory_space<vmem>>, %arg2: memref<32x128xbf16, #tpu.memory_space<vmem>>, %arg3: memref<1x128xf32, #tpu.memory_space<vmem>>, %arg4: memref<32x128xbf16, #tpu.memory_space<vmem>>) attributes {dimension_semantics = [#tpu.dimension_semantics<parallel>], iteration_bounds = array<i64: 1>, scalar_prefetch = 0 : i64, scratch_operands = 0 : i64, tpu.core_type = #tpu.core_type<tc>, window_params = [{transform_indices = @transform_0, window_bounds = array<i64: 32, 32>}, {pipeline_mode = #tpu.pipeline_mode<synchronous>, transform_indices = @transform_1, window_bounds = array<i64: 32, 128>}, {pipeline_mode = #tpu.pipeline_mode<synchronous>, transform_indices = @transform_2, window_bounds = array<i64: 1, 128>}, {transform_indices = @transform_3, window_bounds = array<i64: 32, 128>}]} {
    %c0 = arith.constant 0 : index
    %c0_0 = arith.constant 0 : index
    %0 = vector.load %arg1[%c0, %c0_0] : memref<32x32xbf16, #tpu.memory_space<vmem>>, vector<32x32xbf16>
    %c0_1 = arith.constant 0 : index
    %c0_2 = arith.constant 0 : index
    %1 = vector.load %arg2[%c0_1, %c0_2] : memref<32x128xbf16, #tpu.memory_space<vmem>>, vector<32x128xbf16>
    %cst = arith.constant dense<0.000000e+00> : vector<32x128xf32>
    %2 = tpu.matmul %0, %1, %cst {dimension_numbers = #tpu.dot_dimension_numbers<[1], [0], [0], [1], [0, 0, 1, 1], [], []>} : vector<32x32xbf16>, vector<32x128xbf16>, vector<32x128xf32> -> vector<32x128xf32>
    %c0_3 = arith.constant 0 : index
    %c0_4 = arith.constant 0 : index
    %3 = vector.load %arg3[%c0_3, %c0_4] : memref<1x128xf32, #tpu.memory_space<vmem>>, vector<1x128xf32>
    %4 = vector.broadcast %3 : vector<1x128xf32> to vector<32x128xf32>
    %5 = arith.addf %2, %4 : vector<32x128xf32>
    %6 = arith.truncf %5 : vector<32x128xf32> to vector<32x128xbf16>
    %c0_5 = arith.constant 0 : index
    %c0_6 = arith.constant 0 : index
    %7 = vector.load %arg4[%c0_5, %c0_6] : memref<32x128xbf16, #tpu.memory_space<vmem>>, vector<32x128xbf16>
    tpu.vector_store %arg4[%c0_5, %c0_6], %6 {strides = array<i32>} : memref<32x128xbf16, #tpu.memory_space<vmem>>, vector<32x128xbf16>,
    return
  }
  func.func @transform_0(%arg0: i32) -> (i32, i32) {
    %c0_i32 = arith.constant 0 : i32
    %c0_i32_0 = arith.constant 0 : i32
    return %arg0, %c0_i32 : i32, i32
  }
  func.func @transform_1(%arg0: i32) -> (i32, i32) {
    %c0_i32 = arith.constant 0 : i32
    %c0_i32_0 = arith.constant 0 : i32
    %c0_i32_1 = arith.constant 0 : i32
    return %c0_i32, %c0_i32_0 : i32, i32
  }
  func.func @transform_2(%arg0: i32) -> (i32, i32) {
    %c0_i32 = arith.constant 0 : i32
    %c0_i32_0 = arith.constant 0 : i32
    %c0_i32_1 = arith.constant 0 : i32
    return %c0_i32, %c0_i32_0 : i32, i32
  }
  func.func @transform_3(%arg0: i32) -> (i32, i32) {
    %c0_i32 = arith.constant 0 : i32
    %c0_i32_0 = arith.constant 0 : i32
    return %arg0, %c0_i32 : i32, i32
  }
}

</mosaic_0001>

<bundles_post_ra>
// kernel: tpu_custom_call.1
= control target key start
LH: loop header
LB: loop body
LE: loop exit
PB: predicated region body
PF: predicated region fallthrough
CT: control target
= control target key end

     0   :  { %8 = vsyncpa [#allocation3], 0  ;;  %s367_s0 = inlined_call_operand.hbm [shape: bf16[32,32], index: 0, kind: input, shape index: {}]   ;;  %s368_s1 = inlined_call_operand.hbm [shape: bf16[32,128], index: 1, kind: input, shape index: {}]   ;;  %s369_s2 = inlined_call_operand.vmem [shape: f32[1,128], index: 2, kind: input, shape index: {}]   ;;  %s370_s3 = inlined_call_operand.hbm [shape: bf16[32,128], index: 3, kind: output, shape index: {}]  }
   0x1   :  { %9 = vsyncpa [#allocation6], 0 }
   0x2   :  { %10 = vsyncpa [#allocation4], 0  ;;  %s294_s12 = smov [#allocation2]   ;;  %s222_s16 = scalar_lea.hbm %s367_s0, 256 }
   0x3   :  { %s16_s13 = sshll.u32 %s294_s12, 4  ;;  %p223_p0 = scmp.ne.s32.totalorder %s367_s0, %s222_s16  ;;  %s17_s13 = int_to_ptr.vmem [resolvable:$true] %s16_s13 }
   0x4   :  { %p226_p1 = scmp.lt.u32.totalorder %s222_s16, %s367_s0 }
   0x6   :  { %p228_p2 = pnand %p226_p1, %p223_p0 }
   0x8   :  { %231 = shalt.err (!%p228_p2)
}
   0x9   :  { %s232_s21 = scalar_lea.vmem %s17_s13, 256  ;;  %p237_p4 = scmp.lt.s32.totalorder %s17_s13, %s17_s13 }
   0xa   :  { %p233_p3 = scmp.ne.s32.totalorder %s17_s13, %s232_s21  ;;  %p238_p5 = scmp.lt.s32.totalorder %s232_s21, %s232_s21 }
   0xc   :  { %p239_p6 = por %p238_p5, %p237_p4 }
   0xe   :  { %p240_p7 = pnand %p239_p6, %p233_p3 }
  0x10   :  { %243 = shalt.err (!%p240_p7)
}
  0x11   :  { %s295_s22 = smov 64   ;;  %s296_s23 = smov 4  }
  0x12   :  { %22 = dma.hbm_to_vmem [thread:$0]  %s367_s0, 256, %s17_s13, [#allocation3], %s295_s22, %s295_s22, %s296_s23  }
  0x13   :  { %s297_s26 = smov [#allocation5]   ;;  %s244_s30 = scalar_lea.hbm %s368_s1, 256 }
  0x14   :  { %s28_s27 = sshll.u32 %s297_s26, 4  ;;  %p245_p8 = scmp.ne.s32.totalorder %s368_s1, %s244_s30  ;;  %s29_s27 = int_to_ptr.vmem [resolvable:$true] %s28_s27 }
  0x15   :  { %p248_p9 = scmp.lt.u32.totalorder %s244_s30, %s368_s1 }
  0x17   :  { %p250_p10 = pnand %p248_p9, %p245_p8 }
  0x19   :  { %253 = shalt.err (!%p250_p10)
}
  0x1a   :  { %s254_s8 = scalar_lea.vmem %s29_s27, 256  ;;  %p259_p12 = scmp.lt.s32.totalorder %s29_s27, %s29_s27 }
  0x1b   :  { %p255_p11 = scmp.ne.s32.totalorder %s29_s27, %s254_s8  ;;  %p260_p13 = scmp.lt.s32.totalorder %s254_s8, %s254_s8 }
  0x1d   :  { %p261_p0 = por %p260_p13, %p259_p12 }
  0x1f   :  { %p262_p1 = pnand %p261_p0, %p255_p11 }
  0x21   :  { %265 = shalt.err (!%p262_p1)
}
  0x22   :  { %34 = dma.hbm_to_vmem [thread:$0]  %s368_s1, 256, %s29_s27, [#allocation6], %s295_s22, %s295_s22, %s296_s23  }
  0x23   :  { %288 = dma.done.wait [#allocation3], 256  }
  0x24   :  { %289 = vsyncadd [#allocation3], 4294967040 }
  0x25   :  { %290 = dma.done.wait [#allocation6], 256  }
  0x26   :  { %291 = vsyncadd [#allocation6], 4294967040  ;;  %v218_v0 = vld [vmem:[#allocation5] sm:$0xff]   ;;  %v219_v1 = vld [vmem:[#allocation5 + $0x8] sm:$0xff]   ;;  %vm81_vm0 = vcmask 261120   ;;  %s298_s1 = smov [#allocation7]  }
  0x27   :  { %205 = vmatprep.subr.bf16.mxu0 %v218_v0  ;;  %v220_v2 = vld [vmem:[#allocation2] sm:$0xff]   ;;  %v221_v3 = vld [vmem:[#allocation2 + $0x8] sm:$0xff]   ;;  %s162_s12 = sshll.u32 %s298_s1, 4  ;;  %s163_s12 = int_to_ptr.vmem [resolvable:$true] %s162_s12 }
  0x28   :  { %206 = vmatpush3.bf16.msra.mxu0 %v218_v0  ;;  %209 = vmatprep.mubr.msk.bf16.mxu0 %vm81_vm0, %v220_v2  ;;  %v175_v5 = vld [vmem:[%s369_s2] ss:$0 sm:$0xff]  ;;  %s266_s13 = scalar_lea.vmem %s163_s12, 256  ;;  %p271_p3 = scmp.lt.s32.totalorder %s163_s12, %s163_s12 }
  0x29   :  { %207 = vmatprep.subr.bf16.mxu0 %v219_v1  ;;  %p267_p2 = scmp.ne.s32.totalorder %s163_s12, %s266_s13  ;;  %p272_p4 = scmp.lt.s32.totalorder %s266_s13, %s266_s13 }
  0x2b   :  { %p273_p5 = por %p272_p4, %p271_p3 }
  0x2c   :  { %208 = vmatpush3.bf16.msra.mxu0 %v219_v1 }
  0x2d   :  { %p274_p6 = pnand %p273_p5, %p267_p2 }
  0x2f   :  { %210 = vmatmul.mubr.msk.bf16.vlgmr.msra.gmra.mrb[0].mxu0 %vm81_vm0, %v221_v3 }
 0x102   :  { %v211_v4 = vpop.f32.mrb[0].mxu0 }
 0x103   :  { %v122_v6 = vpop.f32.mrb[1].mxu0  ;;  %v131_v8 = vadd.f32 %v211_v4, %v175_v5 }
 0x104   :  { %v212_v7 = vpop.f32.mrb[2].mxu0  ;;  %v123_v11 = vadd.f32 %v175_v5, %v122_v6 }
 0x105   :  { %v134_v9 = vadd.f32 %v212_v7, %v175_v5  ;;  %v125_v10 = vpop.f32.mrb[3].mxu0 }
 0x106   :  { %v126_v12 = vadd.f32 %v175_v5, %v125_v10 }
 0x107   :  { %v198_v13 = vpack.c.bf16 %v134_v9, %v131_v8 }
 0x108   :  { %v193_v14 = vpack.c.bf16 %v126_v12, %v123_v11 }
 0x109   :  { %200 = vst [vmem:[#allocation7 + $0x8] sm:$0xff] %v198_v13  }
 0x10a   :  { %194 = vst [vmem:[#allocation7] sm:$0xff] %v193_v14  }
 0x10b   :  { %277 = shalt.err (!%p274_p6)
}
 0x10c   :  { %s278_s15 = scalar_lea.hbm %s370_s3, 256 }
 0x10d   :  { %p279_p7 = scmp.ne.s32.totalorder %s370_s3, %s278_s15  ;;  %p282_p8 = scmp.lt.u32.totalorder %s278_s15, %s370_s3 }
 0x10f   :  { %p284_p9 = pnand %p282_p8, %p279_p7 }
 0x111   :  { %287 = shalt.err (!%p284_p9)
}
 0x112   :  { %168 = dma.vmem_to_hbm [thread:$0]  %s163_s12, 256, %s370_s3, [#allocation4], %s295_s22, %s295_s22, %s296_s23  }
 0x113   :  { %292 = dma.done.wait [#allocation4], 256  }
 0x114   :  { %293 = vsyncadd [#allocation4], 4294967040 }
 0x115   :  { %172 = vsyncpa [#allocation3], 1 }
 0x116   :  { %173 = vsyncpa [#allocation6], 1 }
 0x117   :  { %174 = vsyncpa [#allocation4], 1 }

</bundles_post_ra>
